<compile_context>
chip_gen: v5e
topology: v5e:2x2
jax: 0.10.0
libtpu: 0.0.40
codegen_flags: <defaults>
</compile_context>

<pallas_src>
import functools
import math

import numpy as np
import jax
import jax.numpy as jnp
from jax.experimental import pallas as pl
from jax.experimental.pallas import tpu as pltpu


# ------------------------------ Pallas kernel -------------------------------

def _ghost_kernel(x_ref, w1_ref, b1_ref, wdw_ref, b2_ref, mask_ref, o_ref,
                  *, H, W):
    """Fused GhostModule forward for one image.

    x_ref    : (1, Cin, H*W)  input activations (lanes = flattened spatial)
    w1_ref   : (C1, Cin)      1x1 conv weight with BN1 scale folded in
    b1_ref   : (C1, 1)        folded BN1 bias
    wdw_ref  : (C1, 9)        depthwise 3x3 taps (k = kh*3+kw), BN2 scale folded
    b2_ref   : (C1, 1)        folded BN2 bias
    mask_ref : (9, H*W)       1.0 where the shifted tap stays inside the image
    o_ref    : (1, oup, H*W)  output = concat(primary, cheap)[:oup]
    """
    HW = H * W
    C1 = w1_ref.shape[0]
    oup = o_ref.shape[1]

    # --- primary branch: 1x1 conv as a single MXU matmul + folded BN + ReLU --
    x = x_ref[0]                                               # (Cin, HW)
    x1 = jnp.maximum(
        jnp.dot(w1_ref[...], x, preferred_element_type=jnp.float32)
        + b1_ref[...],
        0.0)                                                   # (C1, HW) f32

    # --- cheap branch: depthwise 3x3 (pad=1) as 9 lane-rolls * boundary masks.
    #     x1 is consumed straight from vregs/VMEM: no im2col, no HBM traffic.
    w_dw = wdw_ref[...]                                        # (C1, 9)
    masks = mask_ref[...]                                      # (9, HW)
    acc = jnp.zeros((C1, HW), jnp.float32)
    for k in range(9):
        oh, ow = k // 3 - 1, k % 3 - 1                         # offsets in {-1,0,1}
        shift = (-(oh * W + ow)) % HW                          # static per tap
        shifted = pltpu.roll(x1, shift=shift, axis=1)          # x1[:, p+oh*W+ow]
        acc = acc + shifted * masks[k:k + 1, :] * w_dw[:, k:k + 1]
    x2 = jnp.maximum(acc + b2_ref[...], 0.0)                   # (C1, HW)

    # --- GhostModule output: concat channels, keep the first `oup` -----------
    out = jnp.concatenate([x1, x2], axis=0)[:oup, :]           # (oup, HW)
    o_ref[0] = out.astype(o_ref.dtype)


# ------------------------------ JAX wrapper ----------------------------------

def _dw_boundary_masks(H, W):
    """Compile-time constant masks zeroing out-of-image taps of the 3x3 conv."""
    hh, ww = np.meshgrid(np.arange(H), np.arange(W), indexing="ij")
    hh, ww = hh.reshape(-1), ww.reshape(-1)
    m = np.zeros((9, H * W), np.float32)
    for k in range(9):
        oh, ow = k // 3 - 1, k % 3 - 1
        m[k] = ((hh + oh >= 0) & (hh + oh < H)
                & (ww + ow >= 0) & (ww + ow < W)).astype(np.float32)
    return jnp.asarray(m)


def ghost_module_forward(x_nchw, fp, *, oup):
    """x_nchw: (N, Cin, H, W); fp: folded params. Returns (N, oup, H, W)."""
    N, Cin, H, W = x_nchw.shape
    C1 = fp["w1"].shape[0]
    HW = H * W
    x_flat = x_nchw.reshape(N, Cin, HW)        # free, NCHW-native
    masks = _dw_boundary_masks(H, W)

    out = pl.pallas_call(
        functools.partial(_ghost_kernel, H=H, W=W),
        out_shape=jax.ShapeDtypeStruct((N, oup, HW), x_nchw.dtype),
        grid_spec=pltpu.PrefetchScalarGridSpec(
            num_scalar_prefetch=0,
            grid=(N,),                          # one image / step; N>=2 keeps both v7x TCs busy
            in_specs=[
                pl.BlockSpec((1, Cin, HW), lambda n: (n, 0, 0)),
                pl.BlockSpec((C1, Cin), lambda n: (0, 0)),
                pl.BlockSpec((C1, 1), lambda n: (0, 0)),
                pl.BlockSpec((C1, 9), lambda n: (0, 0)),
                pl.BlockSpec((C1, 1), lambda n: (0, 0)),
                pl.BlockSpec((9, HW), lambda n: (0, 0)),
            ],
            out_specs=pl.BlockSpec((1, oup, HW), lambda n: (n, 0, 0)),
        ),
        compiler_params=pltpu.CompilerParams(
            dimension_semantics=("parallel",)),
    )(x_flat, fp["w1"], fp["b1"], fp["wdw"], fp["b2"], masks)
    # TODO(synk): for large H*W, tile the spatial (lane) axis with a one-row
    # halo instead of whole-image blocks; unnecessary at these sizes.
    return out.reshape(N, oup, H, W)


# --------------------------- params + BN folding -----------------------------

def make_params(key, inp, oup, ratio=2):
    init_ch = math.ceil(oup / ratio)
    new_ch = init_ch * (ratio - 1)
    # Implemented for the module defaults: kernel_size=1, ratio=2 (pure
    # depthwise cheap op), dw_size=3, stride=1, relu=True.
    # TODO(synk): general ratio/stride needs grouped-channel replication and
    # strided output indexing in the kernel.
    assert ratio == 2 and new_ch == init_ch
    ks = jax.random.split(key, 10)
    return {
        "pw": jax.random.normal(ks[0], (init_ch, inp, 1, 1), jnp.float32)
              / math.sqrt(inp),
        "dw": jax.random.normal(ks[1], (new_ch, 1, 3, 3), jnp.float32) / 3.0,
        "g1": jax.random.uniform(ks[2], (init_ch,), jnp.float32, 0.5, 1.5),
        "be1": 0.1 * jax.random.normal(ks[3], (init_ch,), jnp.float32),
        "m1": 0.1 * jax.random.normal(ks[4], (init_ch,), jnp.float32),
        "v1": jax.random.uniform(ks[5], (init_ch,), jnp.float32, 0.5, 1.5),
        "g2": jax.random.uniform(ks[6], (new_ch,), jnp.float32, 0.5, 1.5),
        "be2": 0.1 * jax.random.normal(ks[7], (new_ch,), jnp.float32),
        "m2": 0.1 * jax.random.normal(ks[8], (new_ch,), jnp.float32),
        "v2": jax.random.uniform(ks[9], (new_ch,), jnp.float32, 0.5, 1.5),
    }


def fold_params(p, eps=1e-5):
    """Fold inference-mode BatchNorm into the conv weights/biases (one time)."""
    # TODO(synk): training-mode BN (batch statistics) is not modeled; this is
    # the standard eval-mode fold.
    s1 = p["g1"] / jnp.sqrt(p["v1"] + eps)
    s2 = p["g2"] / jnp.sqrt(p["v2"] + eps)
    c1 = p["dw"].shape[0]
    return {
        "w1": p["pw"][:, :, 0, 0] * s1[:, None],                     # (C1, Cin)
        "b1": (p["be1"] - p["m1"] * s1)[:, None],                    # (C1, 1)
        "wdw": p["dw"][:, 0, :, :].reshape(c1, 9) * s2[:, None],     # (C1, 9)
        "b2": (p["be2"] - p["m2"] * s2)[:, None],                    # (C1, 1)
    }


# --------------------------- pure-JAX reference ------------------------------

def reference_forward(x, p, oup, eps=1e-5):
    def bn(y, g, b, m, v):
        s = g / jnp.sqrt(v + eps)
        return y * s[None, :, None, None] + (b - m * s)[None, :, None, None]

    y1 = jax.lax.conv_general_dilated(
        x, p["pw"], (1, 1), [(0, 0), (0, 0)],
        dimension_numbers=("NCHW", "OIHW", "NCHW"))
    x1 = jax.nn.relu(bn(y1, p["g1"], p["be1"], p["m1"], p["v1"]))

    c1 = p["dw"].shape[0]
    y2 = jax.lax.conv_general_dilated(
        x1, p["dw"], (1, 1), [(1, 1), (1, 1)],
        dimension_numbers=("NCHW", "OIHW", "NCHW"),
        feature_group_count=c1)
    x2 = jax.nn.relu(bn(y2, p["g2"], p["be2"], p["m2"], p["v2"]))
    return jnp.concatenate([x1, x2], axis=1)[:, :oup]


# ----------------------------------- main ------------------------------------

if __name__ == "__main__":
    inp, oup = 16, 32            # GhostModule(inp=16, oup=32) -> init_channels=16
    N, H, W = 2, 16, 16          # H*W = 256 lanes (lane-dense), grid of 2 steps

    key = jax.random.PRNGKey(0)
    kx, kp = jax.random.split(key)
    x = jax.random.normal(kx, (N, inp, H, W), jnp.float32)
    raw = make_params(kp, inp, oup)
    folded = fold_params(raw)

    fwd = jax.jit(functools.partial(ghost_module_forward, oup=oup))
    out = fwd(x, folded)
    jax.block_until_ready(out)

    ref = reference_forward(x, raw, oup)
    assert out.shape == ref.shape == (N, oup, H, W)
    assert jnp.allclose(out, ref, atol=1e-3, rtol=1e-3), float(
        jnp.max(jnp.abs(out - ref)))

    print("KERNEL_OK")
</pallas_src>

<mosaic_0001>
module attributes {stable_mosaic.version = 11 : i64} {
  func.func @_ghost_kernel(%arg0: i32, %arg1: memref<1x16x256xf32, #tpu.memory_space<vmem>>, %arg2: memref<16x16xf32, #tpu.memory_space<vmem>>, %arg3: memref<16x1xf32, #tpu.memory_space<vmem>>, %arg4: memref<16x9xf32, #tpu.memory_space<vmem>>, %arg5: memref<16x1xf32, #tpu.memory_space<vmem>>, %arg6: memref<9x256xf32, #tpu.memory_space<vmem>>, %arg7: memref<1x32x256xf32, #tpu.memory_space<vmem>>) attributes {dimension_semantics = [#tpu.dimension_semantics<parallel>], iteration_bounds = array<i64: 2>, scalar_prefetch = 0 : i64, scratch_operands = 0 : i64, tpu.core_type = #tpu.core_type<tc>, window_params = [{transform_indices = @transform_0, window_bounds = array<i64: 1, 16, 256>}, {pipeline_mode = #tpu.pipeline_mode<synchronous>, transform_indices = @transform_1, window_bounds = array<i64: 16, 16>}, {pipeline_mode = #tpu.pipeline_mode<synchronous>, transform_indices = @transform_2, window_bounds = array<i64: 16, 1>}, {pipeline_mode = #tpu.pipeline_mode<synchronous>, transform_indices = @transform_3, window_bounds = array<i64: 16, 9>}, {pipeline_mode = #tpu.pipeline_mode<synchronous>, transform_indices = @transform_4, window_bounds = array<i64: 16, 1>}, {pipeline_mode = #tpu.pipeline_mode<synchronous>, transform_indices = @transform_5, window_bounds = array<i64: 9, 256>}, {transform_indices = @transform_6, window_bounds = array<i64: 1, 32, 256>}]} {
    %c0 = arith.constant 0 : index
    %c0_0 = arith.constant 0 : index
    %c0_1 = arith.constant 0 : index
    %0 = vector.load %arg1[%c0, %c0_0, %c0_1] : memref<1x16x256xf32, #tpu.memory_space<vmem>>, vector<1x16x256xf32>
    %1 = vector.shape_cast %0 : vector<1x16x256xf32> to vector<16x256xf32>
    %c0_2 = arith.constant 0 : index
    %c0_3 = arith.constant 0 : index
    %2 = vector.load %arg2[%c0_2, %c0_3] : memref<16x16xf32, #tpu.memory_space<vmem>>, vector<16x16xf32>
    %cst = arith.constant dense<0.000000e+00> : vector<16x256xf32>
    %3 = tpu.matmul %2, %1, %cst {dimension_numbers = #tpu.dot_dimension_numbers<[1], [0], [0], [1], [0, 0, 1, 1], [], []>} : vector<16x16xf32>, vector<16x256xf32>, vector<16x256xf32> -> vector<16x256xf32>
    %c0_4 = arith.constant 0 : index
    %c0_5 = arith.constant 0 : index
    %4 = vector.load %arg3[%c0_4, %c0_5] : memref<16x1xf32, #tpu.memory_space<vmem>>, vector<16x1xf32>
    %5 = vector.broadcast %4 : vector<16x1xf32> to vector<16x256xf32>
    %6 = arith.addf %3, %5 : vector<16x256xf32>
    %cst_6 = arith.constant 0.000000e+00 : f32
    %7 = vector.broadcast %cst_6 : f32 to vector<16x256xf32>
    %8 = arith.maximumf %6, %7 : vector<16x256xf32>
    %c0_7 = arith.constant 0 : index
    %c0_8 = arith.constant 0 : index
    %9 = vector.load %arg4[%c0_7, %c0_8] : memref<16x9xf32, #tpu.memory_space<vmem>>, vector<16x9xf32>
    %c0_9 = arith.constant 0 : index
    %c0_10 = arith.constant 0 : index
    %10 = vector.load %arg6[%c0_9, %c0_10] : memref<9x256xf32, #tpu.memory_space<vmem>>, vector<9x256xf32>
    %cst_11 = arith.constant 0.000000e+00 : f32
    %11 = vector.broadcast %cst_11 : f32 to vector<16x256xf32>
    %c17_i32 = arith.constant 17 : i32
    %12 = tpu.dynamic_rotate %8 by %c17_i32 dim 1 : vector<16x256xf32>, i32 -> vector<16x256xf32>
    %13 = vector.extract_strided_slice %10 {offsets = [0, 0], sizes = [1, 256], strides = [1, 1]} : vector<9x256xf32> to vector<1x256xf32>
    %14 = vector.broadcast %13 : vector<1x256xf32> to vector<16x256xf32>
    %15 = arith.mulf %12, %14 : vector<16x256xf32>
    %16 = vector.extract_strided_slice %9 {offsets = [0, 0], sizes = [16, 1], strides = [1, 1]} : vector<16x9xf32> to vector<16x1xf32>
    %17 = vector.broadcast %16 : vector<16x1xf32> to vector<16x256xf32>
    %18 = arith.mulf %15, %17 : vector<16x256xf32>
    %19 = arith.addf %11, %18 : vector<16x256xf32>
    %c16_i32 = arith.constant 16 : i32
    %20 = tpu.dynamic_rotate %8 by %c16_i32 dim 1 : vector<16x256xf32>, i32 -> vector<16x256xf32>
    %21 = vector.extract_strided_slice %10 {offsets = [1, 0], sizes = [1, 256], strides = [1, 1]} : vector<9x256xf32> to vector<1x256xf32>
    %22 = vector.broadcast %21 : vector<1x256xf32> to vector<16x256xf32>
    %23 = arith.mulf %20, %22 : vector<16x256xf32>
    %24 = vector.extract_strided_slice %9 {offsets = [0, 1], sizes = [16, 1], strides = [1, 1]} : vector<16x9xf32> to vector<16x1xf32>
    %25 = vector.broadcast %24 : vector<16x1xf32> to vector<16x256xf32>
    %26 = arith.mulf %23, %25 : vector<16x256xf32>
    %27 = arith.addf %19, %26 : vector<16x256xf32>
    %c15_i32 = arith.constant 15 : i32
    %28 = tpu.dynamic_rotate %8 by %c15_i32 dim 1 : vector<16x256xf32>, i32 -> vector<16x256xf32>
    %29 = vector.extract_strided_slice %10 {offsets = [2, 0], sizes = [1, 256], strides = [1, 1]} : vector<9x256xf32> to vector<1x256xf32>
    %30 = vector.broadcast %29 : vector<1x256xf32> to vector<16x256xf32>
    %31 = arith.mulf %28, %30 : vector<16x256xf32>
    %32 = vector.extract_strided_slice %9 {offsets = [0, 2], sizes = [16, 1], strides = [1, 1]} : vector<16x9xf32> to vector<16x1xf32>
    %33 = vector.broadcast %32 : vector<16x1xf32> to vector<16x256xf32>
    %34 = arith.mulf %31, %33 : vector<16x256xf32>
    %35 = arith.addf %27, %34 : vector<16x256xf32>
    %c1_i32 = arith.constant 1 : i32
    %36 = tpu.dynamic_rotate %8 by %c1_i32 dim 1 : vector<16x256xf32>, i32 -> vector<16x256xf32>
    %37 = vector.extract_strided_slice %10 {offsets = [3, 0], sizes = [1, 256], strides = [1, 1]} : vector<9x256xf32> to vector<1x256xf32>
    %38 = vector.broadcast %37 : vector<1x256xf32> to vector<16x256xf32>
    %39 = arith.mulf %36, %38 : vector<16x256xf32>
    %40 = vector.extract_strided_slice %9 {offsets = [0, 3], sizes = [16, 1], strides = [1, 1]} : vector<16x9xf32> to vector<16x1xf32>
    %41 = vector.broadcast %40 : vector<16x1xf32> to vector<16x256xf32>
    %42 = arith.mulf %39, %41 : vector<16x256xf32>
    %43 = arith.addf %35, %42 : vector<16x256xf32>
    %c0_i32 = arith.constant 0 : i32
    %44 = tpu.dynamic_rotate %8 by %c0_i32 dim 1 : vector<16x256xf32>, i32 -> vector<16x256xf32>
    %45 = vector.extract_strided_slice %10 {offsets = [4, 0], sizes = [1, 256], strides = [1, 1]} : vector<9x256xf32> to vector<1x256xf32>
    %46 = vector.broadcast %45 : vector<1x256xf32> to vector<16x256xf32>
    %47 = arith.mulf %44, %46 : vector<16x256xf32>
    %48 = vector.extract_strided_slice %9 {offsets = [0, 4], sizes = [16, 1], strides = [1, 1]} : vector<16x9xf32> to vector<16x1xf32>
    %49 = vector.broadcast %48 : vector<16x1xf32> to vector<16x256xf32>
    %50 = arith.mulf %47, %49 : vector<16x256xf32>
    %51 = arith.addf %43, %50 : vector<16x256xf32>
    %c255_i32 = arith.constant 255 : i32
    %52 = tpu.dynamic_rotate %8 by %c255_i32 dim 1 : vector<16x256xf32>, i32 -> vector<16x256xf32>
    %53 = vector.extract_strided_slice %10 {offsets = [5, 0], sizes = [1, 256], strides = [1, 1]} : vector<9x256xf32> to vector<1x256xf32>
    %54 = vector.broadcast %53 : vector<1x256xf32> to vector<16x256xf32>
    %55 = arith.mulf %52, %54 : vector<16x256xf32>
    %56 = vector.extract_strided_slice %9 {offsets = [0, 5], sizes = [16, 1], strides = [1, 1]} : vector<16x9xf32> to vector<16x1xf32>
    %57 = vector.broadcast %56 : vector<16x1xf32> to vector<16x256xf32>
    %58 = arith.mulf %55, %57 : vector<16x256xf32>
    %59 = arith.addf %51, %58 : vector<16x256xf32>
    %c241_i32 = arith.constant 241 : i32
    %60 = tpu.dynamic_rotate %8 by %c241_i32 dim 1 : vector<16x256xf32>, i32 -> vector<16x256xf32>
    %61 = vector.extract_strided_slice %10 {offsets = [6, 0], sizes = [1, 256], strides = [1, 1]} : vector<9x256xf32> to vector<1x256xf32>
    %62 = vector.broadcast %61 : vector<1x256xf32> to vector<16x256xf32>
    %63 = arith.mulf %60, %62 : vector<16x256xf32>
    %64 = vector.extract_strided_slice %9 {offsets = [0, 6], sizes = [16, 1], strides = [1, 1]} : vector<16x9xf32> to vector<16x1xf32>
    %65 = vector.broadcast %64 : vector<16x1xf32> to vector<16x256xf32>
    %66 = arith.mulf %63, %65 : vector<16x256xf32>
    %67 = arith.addf %59, %66 : vector<16x256xf32>
    %c240_i32 = arith.constant 240 : i32
    %68 = tpu.dynamic_rotate %8 by %c240_i32 dim 1 : vector<16x256xf32>, i32 -> vector<16x256xf32>
    %69 = vector.extract_strided_slice %10 {offsets = [7, 0], sizes = [1, 256], strides = [1, 1]} : vector<9x256xf32> to vector<1x256xf32>
    %70 = vector.broadcast %69 : vector<1x256xf32> to vector<16x256xf32>
    %71 = arith.mulf %68, %70 : vector<16x256xf32>
    %72 = vector.extract_strided_slice %9 {offsets = [0, 7], sizes = [16, 1], strides = [1, 1]} : vector<16x9xf32> to vector<16x1xf32>
    %73 = vector.broadcast %72 : vector<16x1xf32> to vector<16x256xf32>
    %74 = arith.mulf %71, %73 : vector<16x256xf32>
    %75 = arith.addf %67, %74 : vector<16x256xf32>
    %c239_i32 = arith.constant 239 : i32
    %76 = tpu.dynamic_rotate %8 by %c239_i32 dim 1 : vector<16x256xf32>, i32 -> vector<16x256xf32>
    %77 = vector.extract_strided_slice %10 {offsets = [8, 0], sizes = [1, 256], strides = [1, 1]} : vector<9x256xf32> to vector<1x256xf32>
    %78 = vector.broadcast %77 : vector<1x256xf32> to vector<16x256xf32>
    %79 = arith.mulf %76, %78 : vector<16x256xf32>
    %80 = vector.extract_strided_slice %9 {offsets = [0, 8], sizes = [16, 1], strides = [1, 1]} : vector<16x9xf32> to vector<16x1xf32>
    %81 = vector.broadcast %80 : vector<16x1xf32> to vector<16x256xf32>
    %82 = arith.mulf %79, %81 : vector<16x256xf32>
    %83 = arith.addf %75, %82 : vector<16x256xf32>
    %c0_12 = arith.constant 0 : index
    %c0_13 = arith.constant 0 : index
    %84 = vector.load %arg5[%c0_12, %c0_13] : memref<16x1xf32, #tpu.memory_space<vmem>>, vector<16x1xf32>
    %85 = vector.broadcast %84 : vector<16x1xf32> to vector<16x256xf32>
    %86 = arith.addf %83, %85 : vector<16x256xf32>
    %cst_14 = arith.constant 0.000000e+00 : f32
    %87 = vector.broadcast %cst_14 : f32 to vector<16x256xf32>
    %88 = arith.maximumf %86, %87 : vector<16x256xf32>
    %89 = tpu.concatenate %8, %88 in 0 : vector<16x256xf32>, vector<16x256xf32> -> vector<32x256xf32>
    %c0_15 = arith.constant 0 : index
    %c0_16 = arith.constant 0 : index
    %c0_17 = arith.constant 0 : index
    %90 = vector.load %arg7[%c0_15, %c0_16, %c0_17] : memref<1x32x256xf32, #tpu.memory_space<vmem>>, vector<1x32x256xf32>
    %91 = vector.shape_cast %90 : vector<1x32x256xf32> to vector<32x256xf32>
    %92 = vector.shape_cast %89 : vector<32x256xf32> to vector<1x32x256xf32>
    tpu.vector_store %arg7[%c0_15, %c0_16, %c0_17], %92 {strides = array<i32>} : memref<1x32x256xf32, #tpu.memory_space<vmem>>, vector<1x32x256xf32>,
    return
  }
  func.func @transform_0(%arg0: i32) -> (i32, i32, i32) {
    %c0_i32 = arith.constant 0 : i32
    %c0_i32_0 = arith.constant 0 : i32
    %c0_i32_1 = arith.constant 0 : i32
    return %arg0, %c0_i32, %c0_i32_0 : i32, i32, i32
  }
  func.func @transform_1(%arg0: i32) -> (i32, i32) {
    %c0_i32 = arith.constant 0 : i32
    %c0_i32_0 = arith.constant 0 : i32
    %c0_i32_1 = arith.constant 0 : i32
    return %c0_i32, %c0_i32_0 : i32, i32
  }
  func.func @transform_2(%arg0: i32) -> (i32, i32) {
    %c0_i32 = arith.constant 0 : i32
    %c0_i32_0 = arith.constant 0 : i32
    %c0_i32_1 = arith.constant 0 : i32
    return %c0_i32, %c0_i32_0 : i32, i32
  }
  func.func @transform_3(%arg0: i32) -> (i32, i32) {
    %c0_i32 = arith.constant 0 : i32
    %c0_i32_0 = arith.constant 0 : i32
    %c0_i32_1 = arith.constant 0 : i32
    return %c0_i32, %c0_i32_0 : i32, i32
  }
  func.func @transform_4(%arg0: i32) -> (i32, i32) {
    %c0_i32 = arith.constant 0 : i32
    %c0_i32_0 = arith.constant 0 : i32
    %c0_i32_1 = arith.constant 0 : i32
    return %c0_i32, %c0_i32_0 : i32, i32
  }
  func.func @transform_5(%arg0: i32) -> (i32, i32) {
    %c0_i32 = arith.constant 0 : i32
    %c0_i32_0 = arith.constant 0 : i32
    %c0_i32_1 = arith.constant 0 : i32
    return %c0_i32, %c0_i32_0 : i32, i32
  }
  func.func @transform_6(%arg0: i32) -> (i32, i32, i32) {
    %c0_i32 = arith.constant 0 : i32
    %c0_i32_0 = arith.constant 0 : i32
    %c0_i32_1 = arith.constant 0 : i32
    return %arg0, %c0_i32, %c0_i32_0 : i32, i32, i32
  }
}

</mosaic_0001>

<bundles_post_ra>
// kernel: ghost_module_forward.1
= control target key start
LH: loop header
LB: loop body
LE: loop exit
PB: predicated region body
PF: predicated region fallthrough
CT: control target
= control target key end

     0   :  { %s851_s21 = smov 0   ;;  %s1237_s0 = inlined_call_operand.vmem [shape: f32[2,16,256], index: 0, kind: input, shape index: {}]   ;;  %s1238_s1 = inlined_call_operand.vmem [shape: f32[16,16], index: 1, kind: input, shape index: {}]   ;;  %s1239_s2 = inlined_call_operand.vmem [shape: f32[16,1], index: 2, kind: input, shape index: {}]   ;;  %s1240_s3 = inlined_call_operand.vmem [shape: f32[16,9], index: 3, kind: input, shape index: {}]   ;;  %s1241_s4 = inlined_call_operand.vmem [shape: f32[16,1], index: 4, kind: input, shape index: {}]   ;;  %s1242_s5 = inlined_call_operand.vmem [shape: f32[9,256], index: 5, kind: input, shape index: {}]   ;;  %s1243_s6 = inlined_call_operand.vmem [shape: f32[2,32,256], index: 6, kind: output, shape index: {}]  }
   0x1 LB: > { %s722_s22 = sadd.s32 4294967295, %s797_s21   ;;  %p726_p0 = scmp.ge.s32.totalorder %s797_s21, 1  ;;  %s797_s21 = sphi %s851_s21, %s16_s21  }
   0x2   : > { %p212_p1 = scmp.lt.s32.totalorder %s797_s21, 3 }
   0x4   : > { %p213_p2 = pnand %p726_p0, %p212_p1 }
   0x5   : > { %p242_p3 = scmp.lt.s32.totalorder (!%p213_p2), %s722_s22, 1  ;;  %s807_s19 = smov (!%p213_p2), 1  }
   0x6   : > { %216 = sbr.rel (%p213_p2) target bundleno = 359 (0x167), region = 44  ;;  %s808_s20 = smov (!%p213_p2), 17  }
   0x7   : > { %s810_s23 = smov (!%p213_p2), 16   ;;  %s811_s24 = smov (!%p213_p2), 112  }
   0x8   : > { %s812_s25 = smov (!%p213_p2), 111   ;;  %s813_s26 = smov (!%p213_p2), 15  }
   0xb   : > { %v862_v0 = vld [vmem:[%s1240_s3 + $0x8] sm:$0xff]  ;;  %v258_v1 = vld [vmem:[%s1239_s2] sm:$0xff]  ;;  %v799_v2 = vmov 0   ;;  %s1245_s22 = smov (!%p242_p3, %s722_s22), 1  ;;  %v800_v3 = vmov 2   ;;  %vm270_vm0 = vcmask 130048   ;;  %v341_v51 = vlaneseq }
   0xc   : > { %769 = vset.pattern.permute.xlu1 %v799_v2  ;;  %768 = vset.pattern.permute.xlu0 %v799_v2  ;;  %s737_s27 = sshll.u32 %s1245_s22, 5  ;;  %v259_v8 = vld [vmem:[%s1239_s2 + $0x8] sm:$0xff]  ;;  %v256_v9 = vld [vmem:[%s1238_s1] sm:$0xff]  ;;  %v801_v11 = vmov 1   ;;  %v802_v12 = vmov 3   ;;  %v803_v14 = vmov 5  }
   0xd   : > { %361 = vperm.xlu1 %769, %v862_v0   ;;  %262 = vperm.xlu0 %768, %v258_v1   ;;  %s246_s30 = scalar_lea.vmem %s1237_s0, %s737_s27  ;;  %v257_v10 = vld [vmem:[%s1238_s1 + $0x8] sm:$0xff]  ;;  %v891_v13 = vld [vmem:[%s1240_s3] sm:$0xff]  ;;  %v804_v15 = vmov 4   ;;  %v805_v16 = vmov 6   ;;  %v806_v17 = vmov 7   ;;  %s738_s15 = sshll.u32 %s1245_s22, 6 }
   0xe   : > { %773 = vset.pattern.permute.xlu2 %v800_v3  ;;  %v254_v4 = vld [vmem:[%s246_s30 + $0x10] sm:$0xff]  ;;  %v255_v5 = vld [vmem:[%s246_s30 + $0x18] sm:$0xff]  ;;  %v252_v6 = vld [vmem:[%s246_s30] sm:$0xff]  ;;  %s908_s18 = scalar_lea.vmem %s1243_s6, %s738_s15  ;;  %s809_s22 = smov 113   ;;  %v814_v32 = vmov 8   ;;  %v1018_v54 = vand.u32 127, %v341_v51 }
   0xf   : > { %431 = vperm.xlu2 %773, %v862_v0   ;;  %291 = vmatpush.msra.mxu0 %v254_v4  ;;  %v253_v7 = vld [vmem:[%s246_s30 + $0x8] sm:$0xff]  ;;  %s815_s27 = smov 127   ;;  %v639_v42 = vld [vmem:[%s1241_s4] sm:$0xff] }
  0x10   : > { %739 = vmatpush.msra.mxu2 %v254_v4  ;;  %314 = vmatpush.msra.mxu1 %v255_v5  ;;  %v640_v49 = vld [vmem:[%s1241_s4 + $0x8] sm:$0xff]  ;;  %vm343_vm1 = vcmp.lt.s32.totalorder %v1018_v54, 17  ;;  %vm415_vm2 = vcmp.lt.s32.totalorder %v1018_v54, 15  ;;  %v1029_v60 = vld [vmem:[%s1242_s5] sm:$0xff]  ;;  %vm380_vm3 = vcmp.lt.s32.totalorder %v1018_v54, 16  ;;  %vm450_vm4 = vcmp.lt.s32.totalorder %v1018_v54, 1 }
  0x11   : > { %741 = vmatpush.msra.mxu3 %v255_v5  ;;  %292 = vmatpush.msra.mxu0 %v252_v6  ;;  %v1034_v61 = vld [vmem:[%s1242_s5 + $0x8] sm:$0xff]  ;;  %v348_v63 = vperm.slane %v1029_v60, 0  ;;  %v420_v1 = vperm.slane %v1029_v60, 2  ;;  %v385_v4 = vperm.slane %v1029_v60, 1  ;;  %vm507_vm5 = vcmp.lt.s32.totalorder %v1018_v54, 127 }
  0x12   : > { %740 = vmatpush.msra.mxu2 %v252_v6  ;;  %315 = vmatpush.msra.mxu1 %v253_v7  ;;  %v386_v5 = vperm.slane %v1034_v61, 1  ;;  %vm542_vm6 = vcmp.lt.s32.totalorder %v1018_v54, 113  ;;  %vm577_vm7 = vcmp.lt.s32.totalorder %v1018_v54, 112  ;;  %vm612_vm8 = vcmp.lt.s32.totalorder %v1018_v54, 111 }
  0x13   : > { %742 = vmatpush.msra.mxu3 %v253_v7  ;;  %731 = vmatmul.msk.f32.vlgmr.msra.gmra.mxu0 %vm270_vm0, %v256_v9 }
  0x14   : > { %732 = vmatmul.msk.f32.vlgmr.msra.gmra.mxu2 %vm270_vm0, %v257_v10  ;;  %733 = vmatmul.msk.f32.vlgmr.msra.gmra.mxu1 %vm270_vm0, %v256_v9  ;;  %v455_v9 = vperm.slane %v1029_v60, 3 }
  0x15   : > { %771 = vset.pattern.permute.xlu1 %v801_v11  ;;  %267 = vperm.xlu0 %768, %v259_v8  }
  0x16   : > { %734 = vmatmul.msk.f32.vlgmr.msra.gmra.mxu3 %vm270_vm0, %v257_v10  ;;  %396 = vperm.xlu1 %771, %v862_v0   ;;  %v456_v10 = vperm.slane %v1034_v61, 3 }
  0x17   : > { %775 = vset.pattern.permute.xlu2 %v802_v12 }
  0x18   : > { %466 = vperm.xlu2 %775, %v862_v0  }
  0x1d   : > { %356 = vperm.xlu0 %768, %v891_v13  }
  0x1e   : > { %772 = vset.pattern.permute.xlu1 %v800_v3 }
  0x1f   : > { %427 = vperm.xlu1 %772, %v891_v13  }
  0x20   : > { %779 = vset.pattern.permute.xlu2 %v803_v14 }
  0x21   : > { %523 = vperm.xlu2 %779, %v862_v0  }
  0x25   : > { %770 = vset.pattern.permute.xlu0 %v801_v11 }
  0x26   : > { %392 = vperm.xlu0 %770, %v891_v13  }
  0x27   : > { %774 = vset.pattern.permute.xlu1 %v802_v12 }
  0x28   : > { %462 = vperm.xlu1 %774, %v891_v13  }
  0x29   : > { %781 = vset.pattern.permute.xlu2 %v805_v16 }
  0x2a   : > { %558 = vperm.xlu2 %781, %v862_v0  }
  0x2e   : > { %776 = vset.pattern.permute.xlu0 %v804_v15 }
  0x2f   : > { %484 = vperm.xlu0 %776, %v891_v13  }
  0x30   : > { %777 = vset.pattern.permute.xlu1 %v804_v15 }
  0x31   : > { %488 = vperm.xlu1 %777, %v862_v0  }
  0x32   : > { %782 = vset.pattern.permute.xlu2 %v806_v17 }
  0x33   : > { %589 = vperm.xlu2 %782, %v891_v13  }
  0x37   : > { %783 = vset.pattern.permute.xlu0 %v806_v17 }
  0x39   : > { %778 = vset.pattern.permute.xlu1 %v803_v14 }
  0x3a   : > { %519 = vperm.xlu1 %778, %v891_v13  }
  0x3b   : > { %785 = vset.pattern.permute.xlu2 %v814_v32 }
  0x42   : > { %780 = vset.pattern.permute.xlu1 %v805_v16 }
  0x43   : > { %554 = vperm.xlu1 %780, %v891_v13  }
  0x4b   : > { %784 = vset.pattern.permute.xlu1 %v814_v32 }
  0x69   : > { %v957_v33 = vpop.permute.xlu2 %431 }
  0x72   : > { %v965_v35 = vpop.permute.xlu2 %466 }
  0x7b   : > { %v974_v37 = vpop.permute.xlu2 %523 }
  0x7f   : > { %v263_v18 = vpop.permute.xlu0 %262  ;;  %v959_v34 = vpop.permute.xlu1 %361 }
  0x84   : > { %v984_v39 = vpop.permute.xlu2 %558 }
  0x87   : > { %v268_v25 = vpop.permute.xlu0 %267 }
  0x88   : > { %v967_v36 = vpop.permute.xlu1 %396 }
  0x8d   : > { %v998_v41 = vpop.permute.xlu2 %589 }
  0x8f   : > { %v357_v43 = vpop.permute.xlu0 %356 }
  0x90   : > { %v294_v19 = vpop.f32.mrf.mxu0 }
  0x91   : > { %v295_v20 = vadd.f32 %v294_v19, %v263_v18  ;;  %v317_v21 = vpop.f32.mrf.mxu1  ;;  %v982_v38 = vpop.permute.xlu1 %427 }
  0x92   : > { %v318_v22 = vadd.f32 %v317_v21, %v263_v18  ;;  %v477_v21 = vperm.slane %v1029_v60, 4 }
  0x93   : > { %v910_v23 = vmax.f32 %v295_v20, 0.0 }
  0x94   : > { %v912_v24 = vmax.f32 %v318_v22, 0.0  ;;  %v478_v22 = vperm.slane %v1034_v61, 4 }
  0x95   : > { %659 = vst [vmem:[%s908_s18] sm:$0xff] %v910_v23  ;;  %442 = vrot.lane.b32.xlu0 %v910_v23, %s807_s19  ;;  %333 = vrot.lane.b32.xlu1 %v910_v23, %s808_s20  ;;  %v479_v51 = vmul.f32 %v477_v21, %v910_v23 }
  0x96   : > { %660 = vst [vmem:[%s908_s18 + $0x8] sm:$0xff] %v912_v24  ;;  %337 = vrot.lane.b32.xlu2 %v912_v24, %s808_s20 }
  0x97   : > { %v297_v26 = vpop.f32.mrf.mxu2 }
  0x98   : > { %v298_v27 = vadd.f32 %v297_v26, %v268_v25  ;;  %v393_v47 = vpop.permute.xlu0 %392 }
  0x99   : > { %v320_v28 = vpop.f32.mrf.mxu3 }
  0x9a   : > { %v321_v29 = vadd.f32 %v320_v28, %v268_v25  ;;  %v924_v30 = vmax.f32 %v298_v27, 0.0  ;;  %v991_v40 = vpop.permute.xlu1 %462 }
  0x9c   : > { %v926_v31 = vmax.f32 %v321_v29, 0.0  ;;  %661 = vst [vmem:[%s908_s18 + $0x10] sm:$0xff] %v924_v30 }
  0x9d   : > { %534 = vrot.lane.b32.xlu0 %v910_v23, %s809_s22  ;;  %376 = vrot.lane.b32.xlu1 %v912_v24, %s810_s23 }
  0x9e   : > { %662 = vst [vmem:[%s908_s18 + $0x18] sm:$0xff] %v926_v31  ;;  %372 = vrot.lane.b32.xlu2 %v910_v23, %s810_s23 }
  0xa1   : > { %v485_v52 = vpop.permute.xlu0 %484 }
  0xa3   : > { %v1004_v44 = vpop.permute.xlu1 %488 }
  0xa5   : > { %569 = vrot.lane.b32.xlu0 %v910_v23, %s811_s24  ;;  %604 = vrot.lane.b32.xlu1 %v910_v23, %s812_s25 }
  0xa6   : > { %407 = vrot.lane.b32.xlu2 %v910_v23, %s813_s26 }
  0xac   : > { %v1008_v46 = vpop.permute.xlu1 %519 }
  0xad   : > { %608 = vrot.lane.b32.xlu0 %v912_v24, %s812_s25  ;;  %335 = vrot.lane.b32.xlu1 %v924_v30, %s808_s20 }
  0xae   : > { %411 = vrot.lane.b32.xlu2 %v912_v24, %s813_s26 }
  0xb5   : > { %374 = vrot.lane.b32.xlu0 %v924_v30, %s810_s23  ;;  %409 = vrot.lane.b32.xlu1 %v924_v30, %s813_s26  ;;  %v1016_v50 = vpop.permute.xlu1 %554 }
  0xb6   : > { %446 = vrot.lane.b32.xlu2 %v912_v24, %s807_s19 }
  0xbd   : > { %413 = vrot.lane.b32.xlu0 %v926_v31, %s813_s26  ;;  %444 = vrot.lane.b32.xlu1 %v924_v30, %s807_s19 }
  0xbe   : > { %499 = vrot.lane.b32.xlu2 %v910_v23, %s815_s27 }
  0xc5   : > { %448 = vrot.lane.b32.xlu0 %v926_v31, %s807_s19  ;;  %501 = vrot.lane.b32.xlu1 %v924_v30, %s815_s27 }
  0xc6   : > { %503 = vrot.lane.b32.xlu2 %v912_v24, %s815_s27 }
  0xcd   : > { %505 = vrot.lane.b32.xlu0 %v926_v31, %s815_s27  ;;  %536 = vrot.lane.b32.xlu1 %v924_v30, %s809_s22 }
  0xce   : > { %538 = vrot.lane.b32.xlu2 %v912_v24, %s809_s22 }
  0xd5   : > { %540 = vrot.lane.b32.xlu0 %v926_v31, %s809_s22  ;;  %571 = vrot.lane.b32.xlu1 %v924_v30, %s811_s24 }
  0xd6   : > { %573 = vrot.lane.b32.xlu2 %v912_v24, %s811_s24 }
  0xdd   : > { %575 = vrot.lane.b32.xlu0 %v926_v31, %s811_s24  ;;  %624 = vperm.xlu1 %784, %v891_v13  }
  0xde   : > { %339 = vrot.lane.b32.xlu2 %v926_v31, %s808_s20 }
  0xe5   : > { %593 = vperm.xlu0 %783, %v862_v0   ;;  %610 = vrot.lane.b32.xlu1 %v926_v31, %s812_s25 }
  0xe6   : > { %378 = vrot.lane.b32.xlu2 %v926_v31, %s810_s23  ;;  %786 = vset.pattern.permute.xlu1 %v799_v2 }
  0xed   : > { %643 = vperm.xlu1 %786, %v639_v42   ;;  %788 = vset.pattern.permute.xlu0 %v799_v2 }
  0xee   : > { %628 = vperm.xlu2 %785, %v862_v0   ;;  %v349_v0 = vperm.slane %v1034_v61, 0 }
  0xf0   : > { %v338_v45 = vpop.permute.xlu2 %337 }
  0xf6   : > { %606 = vrot.lane.b32.xlu2 %v924_v30, %s812_s25 }
  0xf7   : > { %787 = vset.pattern.permute.xlu2 %v799_v2  ;;  %v421_v2 = vperm.slane %v1034_v61, 2 }
  0xf8   : > { %v373_v48 = vpop.permute.xlu2 %372 }
  0xfe   : > { %648 = vperm.xlu2 %787, %v640_v49  }
 0x100   : > { %v408_v53 = vpop.permute.xlu2 %407 }
 0x107   : > { %v443_v55 = vpop.permute.xlu0 %442  ;;  %v334_v56 = vpop.permute.xlu1 %333 }
 0x108   : > { %v412_v57 = vpop.permute.xlu2 %411  ;;  %v344_v58 = vsel %vm343_vm1, %v334_v56, %v338_v45  ;;  %v346_v59 = vsel %vm343_vm1, %v338_v45, %v334_v56 }
 0x109   : > { %v416_v62 = vsel %vm415_vm2, %v408_v53, %v412_v57  ;;  %v418_v3 = vsel %vm415_vm2, %v412_v57, %v408_v53  ;;  %v350_v6 = vmul.f32 %v348_v63, %v346_v59  ;;  %v351_v7 = vmul.f32 %v349_v0, %v344_v58 }
 0x10a   : > { %v422_v12 = vmul.f32 %v420_v1, %v418_v3  ;;  %v423_v13 = vmul.f32 %v421_v2, %v416_v62  ;;  %v491_v59 = vmul.f32 %v485_v52, %v479_v51 }
 0x10b   : > { %v364_v25 = vmul.f32 %v357_v43, %v350_v6  ;;  %v365_v26 = vmul.f32 %v357_v43, %v351_v7  ;;  %v480_v43 = vmul.f32 %v478_v22, %v912_v24 }
 0x10c   : > { %v434_v42 = vmul.f32 %v982_v38, %v422_v12  ;;  %v435_v45 = vmul.f32 %v982_v38, %v423_v13  ;;  %v513_v12 = vperm.slane %v1034_v61, 5 }
 0x10d   : > { %v492_v62 = vmul.f32 %v485_v52, %v480_v43 }
 0x10f   : > { %v535_v8 = vpop.permute.xlu0 %534  ;;  %v377_v11 = vpop.permute.xlu1 %376 }
 0x110   : > { %v447_v14 = vpop.permute.xlu2 %446  ;;  %v381_v15 = vsel %vm380_vm3, %v373_v48, %v377_v11  ;;  %v383_v16 = vsel %vm380_vm3, %v377_v11, %v373_v48 }
 0x111   : > { %v451_v17 = vsel %vm450_vm4, %v443_v55, %v447_v14  ;;  %v453_v18 = vsel %vm450_vm4, %v447_v14, %v443_v55  ;;  %v387_v19 = vmul.f32 %v385_v4, %v383_v16  ;;  %v388_v20 = vmul.f32 %v386_v5, %v381_v15 }
 0x112   : > { %v457_v27 = vmul.f32 %v455_v9, %v453_v18  ;;  %v458_v28 = vmul.f32 %v456_v10, %v451_v17  ;;  %v547_v17 = vperm.slane %v1029_v60, 6  ;;  %v548_v18 = vperm.slane %v1034_v61, 6 }
 0x113   : > { %v399_v29 = vmul.f32 %v393_v47, %v387_v19  ;;  %v400_v32 = vmul.f32 %v393_v47, %v388_v20 }
 0x114   : > { %v469_v53 = vmul.f32 %v991_v40, %v457_v27  ;;  %v470_v55 = vmul.f32 %v991_v40, %v458_v28  ;;  %v512_v40 = vperm.slane %v1029_v60, 5 }
 0x115   : > { %v403_v48 = vadd.f32 %v399_v29, %v364_v25  ;;  %v404_v49 = vadd.f32 %v400_v32, %v365_v26 }
 0x117   : > { %v438_v56 = vadd.f32 %v434_v42, %v403_v48  ;;  %v439_v47 = vadd.f32 %v435_v45, %v404_v49  ;;  %v1086_v57 = vpop.permute.xlu0 %569  ;;  %v1088_v58 = vpop.permute.xlu1 %604 }
 0x118   : > { %v500_v38 = vpop.permute.xlu2 %499 }
 0x119   : > { %v473_v3 = vadd.f32 %v469_v53, %v438_v56  ;;  %v474_v6 = vadd.f32 %v470_v55, %v439_v47 }
 0x11b   : > { %v495_v23 = vadd.f32 %v491_v59, %v473_v3  ;;  %v496_v7 = vadd.f32 %v492_v62, %v474_v6 }
 0x11f   : > { %v1091_v24 = vpop.permute.xlu0 %608  ;;  %v336_v11 = vpop.permute.xlu1 %335 }
 0x120   : > { %v504_v13 = vpop.permute.xlu2 %503 }
 0x121   : > { %v508_v14 = vsel %vm507_vm5, %v500_v38, %v504_v13  ;;  %v510_v52 = vsel %vm507_vm5, %v504_v13, %v500_v38 }
 0x122   : > { %v514_v15 = vmul.f32 %v512_v40, %v508_v14  ;;  %v515_v16 = vmul.f32 %v513_v12, %v510_v52 }
 0x124   : > { %v526_v25 = vmul.f32 %v1008_v46, %v514_v15  ;;  %v527_v26 = vmul.f32 %v1008_v46, %v515_v16  ;;  %v583_v46 = vperm.slane %v1034_v61, 7 }
 0x126   : > { %v530_v45 = vadd.f32 %v526_v25, %v495_v23  ;;  %v531_v48 = vadd.f32 %v527_v26, %v496_v7 }
 0x127   : > { %v375_v19 = vpop.permute.xlu0 %374  ;;  %v410_v20 = vpop.permute.xlu1 %409 }
 0x128   : > { %v539_v27 = vpop.permute.xlu2 %538 }
 0x129   : > { %v543_v28 = vsel %vm542_vm6, %v535_v8, %v539_v27  ;;  %v545_v29 = vsel %vm542_vm6, %v539_v27, %v535_v8 }
 0x12a   : > { %v549_v32 = vmul.f32 %v547_v17, %v543_v28  ;;  %v550_v42 = vmul.f32 %v548_v18, %v545_v29 }
 0x12c   : > { %v561_v49 = vmul.f32 %v1016_v50, %v549_v32  ;;  %v562_v51 = vmul.f32 %v1016_v50, %v550_v42 }
 0x12e   : > { %v566_v43 = vadd.f32 %v562_v51, %v531_v48  ;;  %v1120_v53 = vadd.f32 %v561_v49, %v530_v45 }
 0x12f   : > { %v414_v8 = vpop.permute.xlu0 %413  ;;  %v445_v55 = vpop.permute.xlu1 %444 }
 0x130   : > { %v574_v56 = vpop.permute.xlu2 %573  ;;  %v417_v13 = vsel %vm415_vm2, %v410_v20, %v414_v8  ;;  %v419_v14 = vsel %vm415_vm2, %v414_v8, %v410_v20 }
 0x131   : > { %v580_v47 = vsel %vm577_vm7, %v574_v56, %v1086_v57  ;;  %v424_v27 = vmul.f32 %v420_v1, %v419_v14  ;;  %v578_v48 = vsel %vm577_vm7, %v1086_v57, %v574_v56  ;;  %v789_v56 = vld [vmem:[%s1242_s5 + $0x10] ss:$0 sm:$0xff] }
 0x132   : > { %v585_v38 = vmul.f32 %v583_v46, %v580_v47 }
 0x133   : > { %v436_v49 = vmul.f32 %v957_v33, %v424_v27 }
 0x134   : > { %v597_v59 = vmul.f32 %v998_v41, %v585_v38 }
 0x136   : > { %v1128_v50 = vadd.f32 %v597_v59, %v566_v43  ;;  %v790_v59 = vld [vmem:[%s1242_s5 + $0x18] ss:$0 sm:$0xff] }
 0x137   : > { %v449_v62 = vpop.permute.xlu0 %448  ;;  %v502_v3 = vpop.permute.xlu1 %501 }
 0x138   : > { %v340_v6 = vpop.permute.xlu2 %339  ;;  %v452_v29 = vsel %vm450_vm4, %v445_v55, %v449_v62 }
 0x139   : > { %v345_v23 = vsel %vm343_vm1, %v336_v11, %v340_v6  ;;  %v347_v7 = vsel %vm343_vm1, %v340_v6, %v336_v11  ;;  %v425_v11 = vmul.f32 %v421_v2, %v417_v13  ;;  %v582_v2 = vperm.slane %v1029_v60, 7 }
 0x13a   : > { %v352_v16 = vmul.f32 %v348_v63, %v347_v7  ;;  %v353_v25 = vmul.f32 %v349_v0, %v345_v23  ;;  %v454_v63 = vsel %vm450_vm4, %v449_v62, %v445_v55 }
 0x13b   : > { %v437_v51 = vmul.f32 %v957_v33, %v425_v11  ;;  %v482_v33 = vmul.f32 %v478_v22, %v926_v31  ;;  %v615_v31 = vsel %vm612_vm8, %v1091_v24, %v1088_v58 }
 0x13c   : > { %v366_v32 = vmul.f32 %v959_v34, %v352_v16  ;;  %v367_v42 = vmul.f32 %v959_v34, %v353_v25  ;;  %v620_v16 = vmul.f32 %v790_v59, %v615_v31 }
 0x13d   : > { %v494_v13 = vmul.f32 %v1004_v44, %v482_v33 }
 0x13f   : > { %v506_v52 = vpop.permute.xlu0 %505  ;;  %v537_v15 = vpop.permute.xlu1 %536 }
 0x140   : > { %v379_v26 = vpop.permute.xlu2 %378  ;;  %v509_v62 = vsel %vm507_vm5, %v502_v3, %v506_v52 }
 0x141   : > { %v382_v28 = vsel %vm380_vm3, %v375_v19, %v379_v26  ;;  %v384_v20 = vsel %vm380_vm3, %v379_v26, %v375_v19 }
 0x142   : > { %v389_v0 = vmul.f32 %v385_v4, %v384_v20  ;;  %v390_v1 = vmul.f32 %v386_v5, %v382_v28  ;;  %v459_v4 = vmul.f32 %v455_v9, %v454_v63  ;;  %v460_v5 = vmul.f32 %v456_v10, %v452_v29 }
 0x143   : > { %v481_v10 = vmul.f32 %v477_v21, %v924_v30  ;;  %v613_v30 = vsel %vm612_vm8, %v1088_v58, %v1091_v24 }
 0x144   : > { %v401_v19 = vmul.f32 %v967_v36, %v389_v0  ;;  %v402_v45 = vmul.f32 %v967_v36, %v390_v1  ;;  %v584_v36 = vmul.f32 %v582_v2, %v578_v48  ;;  %v471_v57 = vmul.f32 %v965_v35, %v459_v4 }
 0x145   : > { %v472_v9 = vmul.f32 %v965_v35, %v460_v5  ;;  %v511_v35 = vsel %vm507_vm5, %v506_v52, %v502_v3  ;;  %v493_v7 = vmul.f32 %v1004_v44, %v481_v10  ;;  %v516_v3 = vmul.f32 %v512_v40, %v509_v62 }
 0x146   : > { %v405_v43 = vadd.f32 %v401_v19, %v366_v32  ;;  %v406_v34 = vadd.f32 %v402_v45, %v367_v42  ;;  %v596_v23 = vmul.f32 %v998_v41, %v584_v36  ;;  %v517_v14 = vmul.f32 %v513_v12, %v511_v35 }
 0x147   : > { %v541_v8 = vpop.permute.xlu0 %540  ;;  %v572_v55 = vpop.permute.xlu1 %571  ;;  %v619_v52 = vmul.f32 %v789_v56, %v613_v30  ;;  %v528_v40 = vmul.f32 %v974_v37, %v516_v3 }
 0x148   : > { %v440_v47 = vadd.f32 %v436_v49, %v405_v43  ;;  %v441_v38 = vadd.f32 %v437_v51, %v406_v34  ;;  %v629_v6 = vpop.permute.xlu2 %628  ;;  %v544_v25 = vsel %vm542_vm6, %v537_v15, %v541_v8  ;;  %v546_v58 = vsel %vm542_vm6, %v541_v8, %v537_v15 }
 0x149   : > { %v600_v28 = vadd.f32 %v596_v23, %v1120_v53  ;;  %v529_v12 = vmul.f32 %v974_v37, %v517_v14  ;;  %v551_v20 = vmul.f32 %v547_v17, %v544_v25  ;;  %v552_v29 = vmul.f32 %v548_v18, %v546_v58 }
 0x14a   : > { %v475_v21 = vadd.f32 %v471_v57, %v440_v47  ;;  %v476_v22 = vadd.f32 %v472_v9, %v441_v38 }
 0x14b   : > { %v563_v37 = vmul.f32 %v984_v39, %v551_v20  ;;  %v564_v60 = vmul.f32 %v984_v39, %v552_v29 }
 0x14c   : > { %v497_v26 = vadd.f32 %v493_v7, %v475_v21  ;;  %v498_v27 = vadd.f32 %v494_v13, %v476_v22 }
 0x14e   : > { %v532_v53 = vadd.f32 %v528_v40, %v497_v26  ;;  %v533_v32 = vadd.f32 %v529_v12, %v498_v27 }
 0x14f   : > { %v576_v24 = vpop.permute.xlu0 %575  ;;  %v625_v41 = vpop.permute.xlu1 %624 }
 0x150   : > { %v631_v11 = vmul.f32 %v625_v41, %v619_v52  ;;  %v632_v44 = vmul.f32 %v625_v41, %v620_v16  ;;  %v579_v0 = vsel %vm577_vm7, %v572_v55, %v576_v24  ;;  %v581_v1 = vsel %vm577_vm7, %v576_v24, %v572_v55  ;;  %v607_v42 = vpop.permute.xlu2 %606 }
 0x151   : > { %v586_v17 = vmul.f32 %v582_v2, %v579_v0  ;;  %v587_v18 = vmul.f32 %v583_v46, %v581_v1  ;;  %v568_v45 = vadd.f32 %v564_v60, %v533_v32 }
 0x152   : > { %v636_v15 = vadd.f32 %v632_v44, %v1128_v50  ;;  %v635_v63 = vadd.f32 %v631_v11, %v600_v28  ;;  %v567_v50 = vadd.f32 %v563_v37, %v532_v53 }
 0x157   : > { %v594_v19 = vpop.permute.xlu0 %593  ;;  %v611_v48 = vpop.permute.xlu1 %610 }
 0x158   : > { %v598_v4 = vmul.f32 %v594_v19, %v586_v17  ;;  %v599_v5 = vmul.f32 %v594_v19, %v587_v18  ;;  %v614_v49 = vsel %vm612_vm8, %v607_v42, %v611_v48  ;;  %v616_v51 = vsel %vm612_vm8, %v611_v48, %v607_v42  ;;  %v649_v2 = vpop.permute.xlu2 %648 }
 0x159   : > { %v621_v43 = vmul.f32 %v789_v56, %v614_v49  ;;  %v622_v34 = vmul.f32 %v790_v59, %v616_v51 }
 0x15a   : > { %v602_v8 = vadd.f32 %v598_v4, %v567_v50  ;;  %v603_v39 = vadd.f32 %v599_v5, %v568_v45 }
 0x15b   : > { %v633_v61 = vmul.f32 %v629_v6, %v621_v43  ;;  %v634_v46 = vmul.f32 %v629_v6, %v622_v34 }
 0x15d   : > { %v637_v55 = vadd.f32 %v633_v61, %v602_v8  ;;  %v638_v36 = vadd.f32 %v634_v46, %v603_v39 }
 0x15f   : > { %v653_v47 = vadd.f32 %v649_v2, %v637_v55  ;;  %v654_v38 = vadd.f32 %v649_v2, %v638_v36  ;;  %v644_v57 = vpop.permute.xlu1 %643 }
 0x160   : > { %v651_v9 = vadd.f32 %v644_v57, %v635_v63  ;;  %v652_v10 = vadd.f32 %v644_v57, %v636_v15 }
 0x161   : > { %v657_v54 = vmax.f32 %v653_v47, 0.0  ;;  %v658_v33 = vmax.f32 %v654_v38, 0.0 }
 0x162   : > { %v655_v56 = vmax.f32 %v651_v9, 0.0  ;;  %v656_v59 = vmax.f32 %v652_v10, 0.0 }
 0x163   : > { %665 = vst [vmem:[%s908_s18 + $0x30] sm:$0xff] %v657_v54 }
 0x164   : > { %666 = vst [vmem:[%s908_s18 + $0x38] sm:$0xff] %v658_v33 }
 0x165   : > { %663 = vst [vmem:[%s908_s18 + $0x20] sm:$0xff] %v655_v56 }
 0x166   : > { %664 = vst [vmem:[%s908_s18 + $0x28] sm:$0xff] %v656_v59 }
 0x167 PF: > { %s16_s21 = sadd.s32 1, %s797_s21  }
 0x168   : > { %p13_p4 = scmp.ge.s32.totalorder %s16_s21, 4  }
 0x16a   :  { %15 = sbr.rel (!%p13_p4) target bundleno = 1 (0x1), region = 74 }

</bundles_post_ra>
